<compile_context>
chip_gen: v6e
topology: v6e:2x2x1
jax: 0.10.0
libtpu: 0.0.40
codegen_flags: <defaults>
</compile_context>

<pallas_src>
import functools

import jax
import jax.numpy as jnp
from jax.experimental import pallas as pl
from jax.experimental.pallas import tpu as pltpu


_LANE = 128
_TILE_VMEM_BUDGET = 32 * 1024 * 1024   # working-set budget used for tile sizing
_VMEM_LIMIT_BYTES = 48 * 1024 * 1024   # raised scoped VMEM limit (safe on v5e/v6e/v7x)


def _sublane_multiple(dtype) -> int:
    """Rows per vreg sublane group: 8 for 4B, 16 for 2B, 32 for 1B dtypes."""
    itemsize = jnp.dtype(dtype).itemsize
    return max(8, 32 // itemsize)


def _pick_row_tile(rows: int, hidden_p: int, in_dtype, out_dtype) -> int:
    sub = _sublane_multiple(in_dtype)
    in_b = jnp.dtype(in_dtype).itemsize
    out_b = jnp.dtype(out_dtype).itemsize
    # Per-row VMEM bytes: double-buffered input tile + double-buffered output
    # tile + ~one f32 intermediate slab inside the kernel body.
    per_row = hidden_p * (2 * in_b + 2 * out_b + 4)
    tile = (int(_TILE_VMEM_BUDGET) // per_row) // sub * sub
    tile = max(sub, min(tile, 1024))
    rows_up = ((rows + sub - 1) // sub) * sub
    tile = min(tile, rows_up)
    # Keep at least 2 parallel grid steps when there is enough work so both
    # v7x TensorCores (megacore) get a share of this mem-bound grid.
    if rows_up > tile and rows_up < 2 * tile:
        tile = max(sub, (((rows_up + 1) // 2 + sub - 1) // sub) * sub)
    return int(tile)


def _rmsnorm_kernel(x_ref, w_ref, o_ref, *, eps, hidden_true):
    in_dtype = x_ref.dtype
    # Upcast to float32 (matches hidden_states.to(torch.float32)).
    x = x_ref[...].astype(jnp.float32)
    # Sum of squares over the (possibly zero-padded) lane axis; divide by the
    # TRUE hidden size so lane padding does not perturb the mean.
    ss = jnp.sum(x * x, axis=-1, keepdims=True)
    var = ss / float(hidden_true)
    inv = jax.lax.rsqrt(var + eps)
    # torch: hidden_states.to(input_dtype) BEFORE the weight multiply.
    normed = (x * inv).astype(in_dtype)
    # torch: weight * normed, with type promotion -> o_ref.dtype.
    o_ref[...] = (
        w_ref[...].astype(o_ref.dtype) * normed.astype(o_ref.dtype)
    ).astype(o_ref.dtype)


def eagle_rmsnorm(hidden_states, weight, eps=1e-6, *, row_tile=None):
    """RMSNorm over the last axis of `hidden_states` with learnable `weight`."""
    orig_shape = hidden_states.shape
    hidden = orig_shape[-1]
    in_dtype = hidden_states.dtype
    # torch promotion: f32 weight * bf16 normed -> f32 output.
    out_dtype = jnp.result_type(weight.dtype, in_dtype)

    x2d = hidden_states.reshape(-1, hidden)
    rows = x2d.shape[0]

    # Pad hidden to a lane multiple (dense, unmasked vst).
    hidden_p = ((hidden + _LANE - 1) // _LANE) * _LANE

    sub = _sublane_multiple(in_dtype)
    if row_tile is None:
        row_tile = _pick_row_tile(rows, hidden_p, in_dtype, out_dtype)
    row_tile = max(sub, (int(row_tile) // sub) * sub)

    # Pad rows to a tile multiple (handles arbitrary batch*seq).
    rows_p = ((rows + row_tile - 1) // row_tile) * row_tile

    if rows_p != rows or hidden_p != hidden:
        x2d = jnp.pad(x2d, ((0, rows_p - rows), (0, hidden_p - hidden)))
    w2d = weight.reshape(1, hidden)
    if hidden_p != hidden:
        w2d = jnp.pad(w2d, ((0, 0), (0, hidden_p - hidden)))

    grid = (rows_p // row_tile,)

    out = pl.pallas_call(
        functools.partial(_rmsnorm_kernel, eps=eps, hidden_true=hidden),
        out_shape=jax.ShapeDtypeStruct((rows_p, hidden_p), out_dtype),
        grid_spec=pltpu.PrefetchScalarGridSpec(
            num_scalar_prefetch=0,
            grid=grid,
            in_specs=[
                pl.BlockSpec((row_tile, hidden_p), lambda i: (i, 0)),
                # Constant block index -> weight stays resident across steps.
                pl.BlockSpec((1, hidden_p), lambda i: (0, 0)),
            ],
            out_specs=pl.BlockSpec((row_tile, hidden_p), lambda i: (i, 0)),
        ),
        compiler_params=pltpu.CompilerParams(
            dimension_semantics=("parallel",),
            vmem_limit_bytes=_VMEM_LIMIT_BYTES,
        ),
    )(x2d, w2d)

    out = out[:rows, :hidden]
    return out.reshape(orig_shape)


def _reference(x, weight, eps):
    xf = x.astype(jnp.float32)
    var = jnp.mean(xf * xf, axis=-1, keepdims=True)
    normed = (xf * jax.lax.rsqrt(var + eps)).astype(x.dtype)
    return weight * normed


if __name__ == "__main__":
    eps = 1e-6
    key = jax.random.PRNGKey(0)

    # Case 1: shapes implied by the module (batch, seq, hidden), f32, aligned.
    batch, seq, hidden = 2, 8, 128
    k1, k2 = jax.random.split(key)
    x = jax.random.normal(k1, (batch, seq, hidden), dtype=jnp.float32)
    weight = jnp.ones((hidden,), dtype=jnp.float32)  # module init: ones(hidden)

    y = eagle_rmsnorm(x, weight, eps)
    y = jax.block_until_ready(y)
    ref = _reference(x, weight, eps)
    assert y.dtype == ref.dtype
    assert jnp.allclose(y, ref, atol=1e-5, rtol=1e-5), "mismatch vs reference (case 1)"

    # Case 2: non-divisible rows and non-lane-multiple hidden (padding paths).
    b2, s2, h2 = 3, 5, 96
    x2 = jax.random.normal(k2, (b2, s2, h2), dtype=jnp.float32)
    w2 = jnp.ones((h2,), dtype=jnp.float32)
    y2 = jax.block_until_ready(eagle_rmsnorm(x2, w2, eps))
    ref2 = _reference(x2, w2, eps)
    assert jnp.allclose(y2, ref2, atol=1e-5, rtol=1e-5), "mismatch vs reference (case 2)"

    print("KERNEL_OK")
</pallas_src>

<mosaic_0001>
module attributes {stable_mosaic.version = 11 : i64} {
  func.func @_rmsnorm_kernel(%arg0: i32, %arg1: memref<16x128xf32, #tpu.memory_space<vmem>>, %arg2: memref<1x128xf32, #tpu.memory_space<vmem>>, %arg3: memref<16x128xf32, #tpu.memory_space<vmem>>) attributes {dimension_semantics = [#tpu.dimension_semantics<parallel>], iteration_bounds = array<i64: 1>, scalar_prefetch = 0 : i64, scratch_operands = 0 : i64, tpu.core_type = #tpu.core_type<tc>, window_params = [{transform_indices = @transform_0, window_bounds = array<i64: 16, 128>}, {pipeline_mode = #tpu.pipeline_mode<synchronous>, transform_indices = @transform_1, window_bounds = array<i64: 1, 128>}, {transform_indices = @transform_2, window_bounds = array<i64: 16, 128>}]} {
    %c0 = arith.constant 0 : index
    %c0_0 = arith.constant 0 : index
    %0 = vector.load %arg1[%c0, %c0_0] : memref<16x128xf32, #tpu.memory_space<vmem>>, vector<16x128xf32>
    %1 = arith.mulf %0, %0 : vector<16x128xf32>
    %cst = arith.constant dense<0.000000e+00> : vector<16xf32>
    %2 = vector.multi_reduction <add>, %1, %cst [1] : vector<16x128xf32> to vector<16xf32>
    %3 = vector.shape_cast %2 : vector<16xf32> to vector<16x1xf32>
    %cst_1 = arith.constant 1.280000e+02 : f32
    %4 = vector.broadcast %cst_1 : f32 to vector<16x1xf32>
    %5 = arith.divf %3, %4 : vector<16x1xf32>
    %cst_2 = arith.constant 9.99999997E-7 : f32
    %6 = vector.broadcast %cst_2 : f32 to vector<16x1xf32>
    %7 = arith.addf %5, %6 : vector<16x1xf32>
    %8 = math.rsqrt %7 : vector<16x1xf32>
    %9 = vector.broadcast %8 : vector<16x1xf32> to vector<16x128xf32>
    %10 = arith.mulf %0, %9 : vector<16x128xf32>
    %c0_3 = arith.constant 0 : index
    %c0_4 = arith.constant 0 : index
    %11 = vector.load %arg2[%c0_3, %c0_4] : memref<1x128xf32, #tpu.memory_space<vmem>>, vector<1x128xf32>
    %12 = vector.broadcast %11 : vector<1x128xf32> to vector<16x128xf32>
    %13 = arith.mulf %12, %10 : vector<16x128xf32>
    %c0_5 = arith.constant 0 : index
    %c0_6 = arith.constant 0 : index
    %14 = vector.load %arg3[%c0_5, %c0_6] : memref<16x128xf32, #tpu.memory_space<vmem>>, vector<16x128xf32>
    tpu.vector_store %arg3[%c0_5, %c0_6], %13 {strides = array<i32>} : memref<16x128xf32, #tpu.memory_space<vmem>>, vector<16x128xf32>,
    return
  }
  func.func @transform_0(%arg0: i32) -> (i32, i32) {
    %c0_i32 = arith.constant 0 : i32
    %c0_i32_0 = arith.constant 0 : i32
    return %arg0, %c0_i32 : i32, i32
  }
  func.func @transform_1(%arg0: i32) -> (i32, i32) {
    %c0_i32 = arith.constant 0 : i32
    %c0_i32_0 = arith.constant 0 : i32
    %c0_i32_1 = arith.constant 0 : i32
    return %c0_i32, %c0_i32_0 : i32, i32
  }
  func.func @transform_2(%arg0: i32) -> (i32, i32) {
    %c0_i32 = arith.constant 0 : i32
    %c0_i32_0 = arith.constant 0 : i32
    return %arg0, %c0_i32 : i32, i32
  }
}

</mosaic_0001>

<bundles_post_ra>
// kernel: tpu_custom_call.1
= control target key start
LH: loop header
LB: loop body
LE: loop exit
PB: predicated region body
PF: predicated region fallthrough
CT: control target
= control target key end

     0   :  { %7 = vsyncpa [#allocation3], 0  ;;  %s158_s0 = inlined_call_operand.hbm [shape: f32[16,128], index: 0, kind: input, shape index: {}]   ;;  %s159_s1 = inlined_call_operand.vmem [shape: f32[1,128], index: 1, kind: input, shape index: {}]   ;;  %s160_s2 = inlined_call_operand.hbm [shape: f32[16,128], index: 2, kind: output, shape index: {}]  }
   0x1   :  { %8 = vsyncpa [#allocation4], 0  ;;  %s124_s9 = smov [#allocation2]  }
   0x2   :  { %s14_s10 = sshll.u32 %s124_s9, 4  ;;  %s15_s10 = int_to_ptr.vmem [resolvable:$true] %s14_s10 }
   0x3   :  { %s88_s11 = scalar_lea.vmem %s15_s10, 256  ;;  %p93_p1 = scmp.lt.s32.totalorder %s15_s10, %s15_s10 }
   0x4   :  { %p89_p0 = scmp.ne.s32.totalorder %s15_s10, %s88_s11  ;;  %p94_p2 = scmp.lt.s32.totalorder %s88_s11, %s88_s11 }
   0x6   :  { %p95_p3 = por %p94_p2, %p93_p1 }
   0x8   :  { %p96_p4 = pnand %p95_p3, %p89_p0 }
   0xa   :  { %99 = shalt.err (!%p96_p4)
}
   0xb   :  { %s125_s12 = smov 128   ;;  %s126_s13 = smov 8  }
   0xc   :  { %20 = dma.hbm_to_vmem [thread:$0]  %s158_s0, 256, %s15_s10, [#allocation3], %s125_s12, %s125_s12, %s126_s13  }
   0xd   :  { %120 = dma.done.wait [#allocation3], 256  }
   0xe   :  { %121 = vsyncadd [#allocation3], 4294967040  ;;  %v26_v0 = vld [vmem:[#allocation2] sm:$0xff]  ;;  %v27_v1 = vld [vmem:[#allocation2 + $0x8] sm:$0xff]  ;;  %s127_s0 = smov [#allocation5]  }
   0xf   :  { %v28_v2 = vmul.f32 %v26_v0, %v26_v0  ;;  %v29_v3 = vmul.f32 %v27_v1, %v27_v1  ;;  %v71_v11 = vld [vmem:[%s159_s1] ss:$0 sm:$0xff]  ;;  %s59_s18 = sshll.u32 %s127_s0, 4  ;;  %s60_s18 = int_to_ptr.vmem [resolvable:$true] %s59_s18 }
  0x10   :  { %s100_s19 = scalar_lea.vmem %s60_s18, 256  ;;  %p105_p6 = scmp.lt.s32.totalorder %s60_s18, %s60_s18 }
  0x11   :  { %30 = vadd.xlane.f32.xlu0 %v28_v2  ;;  %p101_p5 = scmp.ne.s32.totalorder %s60_s18, %s100_s19  ;;  %p106_p7 = scmp.lt.s32.totalorder %s100_s19, %s100_s19 }
  0x13   :  { %p107_p8 = por %p106_p7, %p105_p6 }
  0x15   :  { %32 = vadd.xlane.f32.xlu0 %v29_v3  ;;  %p108_p9 = pnand %p107_p8, %p101_p5 }
  0x9a   :  { %v31_v4 = vpop.xlane.xlu0 %30 }
  0x9b   :  { %v35_v5 = vmul.f32 0.0078125, %v31_v4 }
  0x9d   :  { %v37_v6 = vadd.f32 1e-06, %v35_v5 }
  0x9e   :  { %v33_v7 = vpop.xlane.xlu0 %32 }
  0x9f   :  { %76 = vrsqrt.f32 %v37_v6  ;;  %v36_v8 = vmul.f32 0.0078125, %v33_v7 }
  0xa1   :  { %v38_v9 = vadd.f32 1e-06, %v36_v8 }
  0xa3   :  { %78 = vrsqrt.f32 %v38_v9 }
  0xac   :  { %v77_v10 = vpop.eup %76 }
  0xad   :  { %v41_v12 = vmul.f32 %v77_v10, %v26_v0 }
  0xaf   :  { %v50_v13 = vmul.f32 %v71_v11, %v41_v12 }
  0xb0   :  { %v79_v14 = vpop.eup %78 }
  0xb1   :  { %v42_v15 = vmul.f32 %v79_v14, %v27_v1  ;;  %52 = vst [vmem:[#allocation5] sm:$0xff] %v50_v13 }
  0xb3   :  { %v51_v16 = vmul.f32 %v71_v11, %v42_v15 }
  0xb5   :  { %53 = vst [vmem:[#allocation5 + $0x8] sm:$0xff] %v51_v16 }
  0xb6   :  { %111 = shalt.err (!%p108_p9)
}
  0xb7   :  { %65 = dma.vmem_to_hbm [thread:$0]  %s60_s18, 256, %s160_s2, [#allocation4], %s125_s12, %s125_s12, %s126_s13  }
  0xb8   :  { %122 = dma.done.wait [#allocation4], 256  }
  0xb9   :  { %123 = vsyncadd [#allocation4], 4294967040 }
  0xba   :  { %69 = vsyncpa [#allocation3], 1 }
  0xbb   :  { %70 = vsyncpa [#allocation4], 1 }

</bundles_post_ra>
